<compile_context>
chip_gen: v7x
topology: tpu7x:2x2x1
jax: 0.10.0
libtpu: 0.0.40
codegen_flags: <defaults>
</compile_context>

<pallas_src>
import functools

import jax
import jax.numpy as jnp
from jax.experimental import pallas as pl
from jax.experimental.pallas import tpu as pltpu


def _mf_bias_kernel(u_ref, v_ref, out_ref):
    # Single mul + lane-axis reduce; biases are already folded into the
    # padded feature columns of U/V.  Accumulate in f32 regardless of the
    # storage dtype of the inputs.
    u = u_ref[...].astype(jnp.float32)            # (TN, Ep)
    v = v_ref[...].astype(jnp.float32)            # (TN, Ep)
    out_ref[...] = jnp.sum(u * v, axis=1, keepdims=True)   # (TN, 1)


@functools.partial(jax.jit, static_argnames=("row_tile", "storage_dtype"))
def mf_bias_forward(u_idx, v_idx, user_emb, item_emb, user_bias, item_bias,
                    row_tile=512, storage_dtype=jnp.float32):
    """Pallas implementation of MF_bias.forward.

    u_idx, v_idx : int32 (N,)
    user_emb     : f32 (num_users, E)
    item_emb     : f32 (num_items, E)
    user_bias    : f32 (num_users, 1)
    item_bias    : f32 (num_items, 1)
    returns      : f32 (N,)

    storage_dtype: dtype the gathered U/V slabs are fed to the kernel in
                   (jnp.bfloat16 halves HBM read traffic on v6e/v7x; the
                   kernel upcasts and accumulates in f32 either way).
    """
    N = u_idx.shape[0]
    E = user_emb.shape[1]

    # Glue: embedding-table gathers (row lookups) in plain JAX.
    U = jnp.take(user_emb, u_idx, axis=0).astype(jnp.float32)        # (N, E)
    V = jnp.take(item_emb, v_idx, axis=0).astype(jnp.float32)        # (N, E)
    bu = jnp.take(user_bias, u_idx, axis=0).astype(jnp.float32)      # (N, 1)
    bv = jnp.take(item_bias, v_idx, axis=0).astype(jnp.float32)      # (N, 1)

    # Fold biases into two extra feature columns (disjoint one-hot placement
    # so b_u and b_v are never multiplied together):
    #   col E   : b_u * 1.0
    #   col E+1 : 1.0 * b_v
    ones = jnp.ones((N, 1), jnp.float32)
    Uall = jnp.concatenate([U, bu, ones], axis=1)                    # (N, E+2)
    Vall = jnp.concatenate([V, ones, bv], axis=1)                    # (N, E+2)

    # Effective row tile: multiple of 8, no larger than the 8-padded batch.
    rt = max(8, min(int(row_tile), pl.cdiv(N, 8) * 8))
    rt = (rt // 8) * 8
    assert rt % 8 == 0, "row tile must be a multiple of 8 (sublane constraint)"

    # Pad rows to the tile and features to a lane multiple (zero rows reduce
    # to zero and are sliced off; Ep is derived from E+2 so the bias columns
    # always fit even when E itself is a multiple of 128).
    Np = pl.cdiv(N, rt) * rt
    Ep = pl.cdiv(E + 2, 128) * 128
    Uall = jnp.pad(Uall, ((0, Np - N), (0, Ep - (E + 2)))).astype(storage_dtype)
    Vall = jnp.pad(Vall, ((0, Np - N), (0, Ep - (E + 2)))).astype(storage_dtype)

    out = pl.pallas_call(
        _mf_bias_kernel,
        out_shape=jax.ShapeDtypeStruct((Np, 1), jnp.float32),
        grid_spec=pltpu.PrefetchScalarGridSpec(
            num_scalar_prefetch=0,
            grid=(Np // rt,),
            in_specs=[
                pl.BlockSpec((rt, Ep), lambda i: (i, 0)),
                pl.BlockSpec((rt, Ep), lambda i: (i, 0)),
            ],
            out_specs=pl.BlockSpec((rt, 1), lambda i: (i, 0)),
        ),
        compiler_params=pltpu.CompilerParams(
            dimension_semantics=("parallel",)),
    )(Uall, Vall)

    return out[:N, 0]


def init_mf_bias_params(key, num_users, num_items, emb_size=100):
    """Deterministic init matching MF_bias.__init__ ranges."""
    k1, k2, k3, k4 = jax.random.split(key, 4)
    user_emb = jax.random.uniform(k1, (num_users, emb_size),
                                  minval=0.0, maxval=0.05, dtype=jnp.float32)
    item_emb = jax.random.uniform(k2, (num_items, emb_size),
                                  minval=0.0, maxval=0.05, dtype=jnp.float32)
    user_bias = jax.random.uniform(k3, (num_users, 1),
                                   minval=-0.01, maxval=0.01, dtype=jnp.float32)
    item_bias = jax.random.uniform(k4, (num_items, 1),
                                   minval=-0.01, maxval=0.01, dtype=jnp.float32)
    return user_emb, item_emb, user_bias, item_bias


def _reference(u_idx, v_idx, user_emb, item_emb, user_bias, item_bias):
    U = user_emb[u_idx]
    V = item_emb[v_idx]
    return (U * V).sum(axis=1) + user_bias[u_idx, 0] + item_bias[v_idx, 0]


if __name__ == "__main__":
    key = jax.random.PRNGKey(0)
    emb_size = 100

    # Small batch (typical toy usage): tile clamps down to 8 rows.
    num_users, num_items, batch = 10, 12, 8
    kp, ku, kv, key = jax.random.split(key, 4)
    params = init_mf_bias_params(kp, num_users, num_items, emb_size)
    u_idx = jax.random.randint(ku, (batch,), 0, num_users, dtype=jnp.int32)
    v_idx = jax.random.randint(kv, (batch,), 0, num_items, dtype=jnp.int32)

    y_hat = mf_bias_forward(u_idx, v_idx, *params)
    jax.block_until_ready(y_hat)
    ref = _reference(u_idx, v_idx, *params)
    assert y_hat.shape == (batch,)
    assert jnp.allclose(y_hat, ref, atol=1e-5, rtol=1e-5)

    # Medium batch: exercises multiple grid steps + row padding with the
    # large (512-row) tile path.
    num_users2, num_items2, batch2 = 50, 60, 600
    kp2, ku2, kv2, key = jax.random.split(key, 4)
    params2 = init_mf_bias_params(kp2, num_users2, num_items2, emb_size)
    u2 = jax.random.randint(ku2, (batch2,), 0, num_users2, dtype=jnp.int32)
    v2 = jax.random.randint(kv2, (batch2,), 0, num_items2, dtype=jnp.int32)

    y2 = mf_bias_forward(u2, v2, *params2)
    jax.block_until_ready(y2)
    ref2 = _reference(u2, v2, *params2)
    assert y2.shape == (batch2,)
    assert jnp.allclose(y2, ref2, atol=1e-5, rtol=1e-5)

    print("KERNEL_OK")
</pallas_src>

<mosaic_0001>
module attributes {stable_mosaic.version = 11 : i64} {
  func.func @_mf_bias_kernel(%arg0: i32, %arg1: memref<8x128xf32, #tpu.memory_space<vmem>>, %arg2: memref<8x128xf32, #tpu.memory_space<vmem>>, %arg3: memref<8x1xf32, #tpu.memory_space<vmem>>) attributes {dimension_semantics = [#tpu.dimension_semantics<parallel>], iteration_bounds = array<i64: 1>, scalar_prefetch = 0 : i64, scratch_operands = 0 : i64, tpu.core_type = #tpu.core_type<tc>, window_params = [{transform_indices = @transform_0, window_bounds = array<i64: 8, 128>}, {transform_indices = @transform_1, window_bounds = array<i64: 8, 128>}, {transform_indices = @transform_2, window_bounds = array<i64: 8, 1>}]} {
    %c0 = arith.constant 0 : index
    %c0_0 = arith.constant 0 : index
    %0 = vector.load %arg1[%c0, %c0_0] : memref<8x128xf32, #tpu.memory_space<vmem>>, vector<8x128xf32>
    %c0_1 = arith.constant 0 : index
    %c0_2 = arith.constant 0 : index
    %1 = vector.load %arg2[%c0_1, %c0_2] : memref<8x128xf32, #tpu.memory_space<vmem>>, vector<8x128xf32>
    %2 = arith.mulf %0, %1 : vector<8x128xf32>
    %cst = arith.constant dense<0.000000e+00> : vector<8xf32>
    %3 = vector.multi_reduction <add>, %2, %cst [1] : vector<8x128xf32> to vector<8xf32>
    %4 = vector.shape_cast %3 : vector<8xf32> to vector<8x1xf32>
    %c0_3 = arith.constant 0 : index
    %c0_4 = arith.constant 0 : index
    %5 = vector.load %arg3[%c0_3, %c0_4] : memref<8x1xf32, #tpu.memory_space<vmem>>, vector<8x1xf32>
    tpu.vector_store %arg3[%c0_3, %c0_4], %4 {strides = array<i32>} : memref<8x1xf32, #tpu.memory_space<vmem>>, vector<8x1xf32>,
    return
  }
  func.func @transform_0(%arg0: i32) -> (i32, i32) {
    %c0_i32 = arith.constant 0 : i32
    %c0_i32_0 = arith.constant 0 : i32
    return %arg0, %c0_i32 : i32, i32
  }
  func.func @transform_1(%arg0: i32) -> (i32, i32) {
    %c0_i32 = arith.constant 0 : i32
    %c0_i32_0 = arith.constant 0 : i32
    return %arg0, %c0_i32 : i32, i32
  }
  func.func @transform_2(%arg0: i32) -> (i32, i32) {
    %c0_i32 = arith.constant 0 : i32
    %c0_i32_0 = arith.constant 0 : i32
    return %arg0, %c0_i32 : i32, i32
  }
}

</mosaic_0001>

<bundles_post_ra>
// kernel: mf_bias_forward.1
= control target key start
LH: loop header
LB: loop body
LE: loop exit
PB: predicated region body
PF: predicated region fallthrough
CT: control target
= control target key end

     0   :  { %vm16_vm0 = vcmask 7168   ;;  %s46_s0 = inlined_call_operand.vmem [shape: f32[8,128], index: 0, kind: input, shape index: {}]   ;;  %s47_s1 = inlined_call_operand.vmem [shape: f32[8,128], index: 1, kind: input, shape index: {}]   ;;  %s48_s2 = inlined_call_operand.vmem [shape: f32[8,1], index: 2, kind: output, shape index: {}]  }
   0x1   :  { %v11_v0 = vld [vmem:[%s46_s0] sm:$0xff] }
   0x2   :  { %v12_v1 = vld [vmem:[%s47_s1] sm:$0xff] }
   0x3   :  { %v13_v2 = vmul.f32 %v12_v1, %v11_v0 }
   0x5   :  { %14 = vadd.xlane.f32.xlu0 %v13_v2 }
  0x92   :  { %v15_v3 = vpop.xlane.xlu0 %14 }
  0x93   :  { %17 = vst.msk [vmem:[%s48_s2] sm:$0xff] %vm16_vm0, %v15_v3 }

</bundles_post_ra>
